<compile_context>
chip_gen: v7x
topology: tpu7x:2x2x1
jax: 0.10.0
libtpu: 0.0.40
codegen_flags: <defaults>
</compile_context>

<pallas_src>
import math

import jax
import jax.numpy as jnp
from jax.experimental import pallas as pl
from jax.experimental.pallas import tpu as pltpu


def _round_up(x, m):
    return ((x + m - 1) // m) * m


def _cdiv(a, b):
    return -(-a // b)


def _vmem_limits():
    """Generation-aware VMEM limit and per-tile budget."""
    try:
        cap = int(pltpu.get_tpu_info().vmem_capacity_bytes)
    except Exception:
        cap = 64 * 1024 * 1024            # conservative (v7x-sized) fallback
    limit = min(cap * 3 // 4, 96 * 1024 * 1024)
    budget = limit // 3                    # headroom for double-buffering + intermediates
    return limit, budget


# ---------------------------------------------------------------------------
# N-D path: logits (N, C, L) viewed as (N, C, L/128, 128), target (N, L/128, 128)
# ---------------------------------------------------------------------------
def _make_nd_kernel(c, s_tile, lanes_per_tile, l_valid, needs_mask):
    def kernel(logits_ref, target_ref, out_ref):
        # logits_ref: (1, C, S, 128) ; target_ref: (1, S, 128) ; out_ref: (1,1,1,1)
        x = logits_ref[0].astype(jnp.float32)               # (C, S, 128)
        t = target_ref[0]                                    # (S, 128) int32

        # log-sum-exp over the class slab axis (pure VPU max/add over C slabs).
        m = jnp.max(x, axis=0)                               # (S, 128)
        lse = jnp.log(jnp.sum(jnp.exp(x - m[None]), axis=0)) # (S, 128)

        # Gather target-class logit with a fused one-hot masked sum.
        cls = jax.lax.broadcasted_iota(jnp.int32, (c, s_tile, 128), 0)
        picked = jnp.sum(jnp.where(cls == t[None], x, 0.0), axis=0)

        nll = (m + lse) - picked                             # (S, 128)

        if needs_mask:
            li = pl.program_id(1)
            sub = jax.lax.broadcasted_iota(jnp.int32, (s_tile, 128), 0)
            lane = jax.lax.broadcasted_iota(jnp.int32, (s_tile, 128), 1)
            pos = li * lanes_per_tile + sub * 128 + lane
            nll = jnp.where(pos < l_valid, nll, jnp.float32(0.0))

        out_ref[...] = jnp.sum(nll, keepdims=True)[None, None]   # (1,1,1,1)

    return kernel


def _ce_nd(logits, target, tile_budget, vmem_limit, max_tile_rows=None):
    n, c = logits.shape[0], logits.shape[1]
    l = math.prod(logits.shape[2:])
    dtype_bytes = logits.dtype.itemsize

    rows = _cdiv(l, 128)

    # Footprint-aware sub-tile selection (rows of 128 lanes).
    #   per row:  2 pipeline buffers of (C*dtype + 4B target) * 128 lanes
    #           + ~(3C + 6) f32 in-kernel intermediates of 128 lanes.
    nb = 2
    per_row = 128 * (nb * (c * dtype_bytes + 4) + (3 * c + 6) * 4)
    s_tile = max(8, min(512, (tile_budget // per_row) // 8 * 8))
    if max_tile_rows is not None:
        s_tile = max(8, min(s_tile, (max_tile_rows // 8) * 8))

    if rows <= s_tile:
        s_tile = rows                     # single tile along spatial (full dim OK)
        num_tiles = 1
        rows_pad = rows
    else:
        num_tiles = _cdiv(rows, s_tile)
        s_tile = _round_up(_cdiv(rows, num_tiles), 8)   # rebalance tiles
        rows_pad = num_tiles * s_tile

    l_pad = rows_pad * 128
    needs_mask = l_pad != l

    logits3 = logits.reshape(n, c, l)                    # contiguous, no HBM shuffle
    target3 = target.reshape(n, l).astype(jnp.int32)
    if needs_mask:
        logits3 = jnp.pad(logits3, ((0, 0), (0, 0), (0, l_pad - l)))
        target3 = jnp.pad(target3, ((0, 0), (0, l_pad - l)))
    logits4 = logits3.reshape(n, c, rows_pad, 128)
    target4 = target3.reshape(n, rows_pad, 128)

    lanes_per_tile = s_tile * 128
    kernel = _make_nd_kernel(c, s_tile, lanes_per_tile, l, needs_mask)

    partials = pl.pallas_call(
        kernel,
        out_shape=jax.ShapeDtypeStruct((n, num_tiles, 1, 1), jnp.float32),
        grid_spec=pltpu.PrefetchScalarGridSpec(
            num_scalar_prefetch=0,
            grid=(n, num_tiles),
            in_specs=[
                pl.BlockSpec((1, c, s_tile, 128), lambda bi, li: (bi, 0, li, 0)),
                pl.BlockSpec((1, s_tile, 128), lambda bi, li: (bi, li, 0)),
            ],
            out_specs=pl.BlockSpec((1, 1, 1, 1), lambda bi, li: (bi, li, 0, 0)),
        ),
        compiler_params=pltpu.CompilerParams(
            dimension_semantics=("parallel", "parallel"),
            vmem_limit_bytes=vmem_limit,
        ),
    )(logits4, target4)
    return partials, n * l


# ---------------------------------------------------------------------------
# 2-D path: logits (M, C) kept as-is (NO transpose); rows on sublanes,
# classes on lanes; reductions along the lane axis.
# ---------------------------------------------------------------------------
def _make_2d_kernel(c, tile_m, m_valid, needs_mask):
    def kernel(logits_ref, target_ref, out_ref):
        # logits_ref: (TILE_M, C) ; target_ref: (TILE_M, 1) ; out_ref: (1,1,1)
        x = logits_ref[...].astype(jnp.float32)
        t = target_ref[...]                                   # (TILE_M, 1)

        mx = jnp.max(x, axis=1, keepdims=True)                # (TILE_M, 1)
        lse = jnp.log(jnp.sum(jnp.exp(x - mx), axis=1, keepdims=True))

        cls = jax.lax.broadcasted_iota(jnp.int32, (1, c), 1)
        picked = jnp.sum(jnp.where(cls == t, x, 0.0), axis=1, keepdims=True)

        nll = (mx + lse) - picked                             # (TILE_M, 1)

        if needs_mask:
            i = pl.program_id(0)
            row = i * tile_m + jax.lax.broadcasted_iota(jnp.int32, (tile_m, 1), 0)
            nll = jnp.where(row < m_valid, nll, jnp.float32(0.0))

        out_ref[...] = jnp.sum(nll, keepdims=True)[None]      # (1,1,1)

    return kernel


def _ce_2d(logits, target, tile_budget, vmem_limit, max_tile_rows=None):
    m, c = logits.shape
    dtype_bytes = logits.dtype.itemsize
    c_pad = _round_up(c, 128)             # lane padding of the VMEM tile

    nb = 2
    per_row = nb * (c_pad * dtype_bytes + 128 * 4) + (3 * c_pad + 6 * 128) * 4
    tile_m = max(8, min(2048, (tile_budget // per_row) // 8 * 8))
    if max_tile_rows is not None:
        tile_m = max(8, min(tile_m, (max_tile_rows // 8) * 8))

    if m <= tile_m:
        tile_m = m                        # single tile (full dim OK)
        num_tiles = 1
        m_pad = m
    else:
        num_tiles = _cdiv(m, tile_m)
        tile_m = _round_up(_cdiv(m, num_tiles), 8)
        m_pad = num_tiles * tile_m
    needs_mask = m_pad != m

    logits2 = logits
    target2 = target.reshape(m, 1).astype(jnp.int32)
    if needs_mask:
        logits2 = jnp.pad(logits2, ((0, m_pad - m), (0, 0)))
        target2 = jnp.pad(target2, ((0, m_pad - m), (0, 0)))

    kernel = _make_2d_kernel(c, tile_m, m, needs_mask)

    partials = pl.pallas_call(
        kernel,
        out_shape=jax.ShapeDtypeStruct((num_tiles, 1, 1), jnp.float32),
        grid_spec=pltpu.PrefetchScalarGridSpec(
            num_scalar_prefetch=0,
            grid=(num_tiles,),
            in_specs=[
                pl.BlockSpec((tile_m, c), lambda i: (i, 0)),
                pl.BlockSpec((tile_m, 1), lambda i: (i, 0)),
            ],
            out_specs=pl.BlockSpec((1, 1, 1), lambda i: (i, 0, 0)),
        ),
        compiler_params=pltpu.CompilerParams(
            dimension_semantics=("parallel",),
            vmem_limit_bytes=vmem_limit,
        ),
    )(logits2, target2)
    return partials, m


# ---------------------------------------------------------------------------
# Public wrapper (matches CrossEntropyLoss.forward for reduction in {mean,sum})
# ---------------------------------------------------------------------------
def cross_entropy_loss(logits, target, reduction="mean", max_tile_rows=None):
    # TODO(synk): reduction='none' (per-element loss output) not implemented.
    assert reduction in ("mean", "sum")

    vmem_limit, tile_budget = _vmem_limits()

    if logits.ndim > 2:
        partials, n_elems = _ce_nd(logits, target, tile_budget, vmem_limit,
                                   max_tile_rows)
    else:
        partials, n_elems = _ce_2d(logits, target, tile_budget, vmem_limit,
                                   max_tile_rows)

    total = jnp.sum(partials)
    if reduction == "mean":
        return total / jnp.float32(n_elems)
    return total


def _reference(logits, target, reduction="mean"):
    """Pure-JAX reference mirroring the PyTorch module."""
    if logits.ndim > 2:
        n, c = logits.shape[0], logits.shape[1]
        logits = jnp.transpose(logits.reshape(n, c, -1), (0, 2, 1)).reshape(-1, c)
    t = target.reshape(-1)
    logp = jax.nn.log_softmax(logits, axis=1)
    nll = -jnp.take_along_axis(logp, t[:, None].astype(jnp.int32), axis=1)
    if reduction == "mean":
        return jnp.mean(nll)
    return jnp.sum(nll)


if __name__ == "__main__":
    key = jax.random.PRNGKey(0)
    k1, k2, k3, k4, k5, k6, k7, k8 = jax.random.split(key, 8)

    # 1) NCHW path: batch=2, classes=4, spatial 16x16 (L = 256, no padding).
    N, C, H, W = 2, 4, 16, 16
    logits = jax.random.normal(k1, (N, C, H, W), dtype=jnp.float32)
    target = jax.random.randint(k2, (N, H, W), 0, C, dtype=jnp.int32)
    loss_mean = jax.block_until_ready(cross_entropy_loss(logits, target, "mean"))
    loss_sum = jax.block_until_ready(cross_entropy_loss(logits, target, "sum"))
    assert jnp.allclose(loss_mean, _reference(logits, target, "mean"), rtol=1e-5, atol=1e-5)
    assert jnp.allclose(loss_sum, _reference(logits, target, "sum"), rtol=1e-4, atol=1e-4)

    # 2) NCHW path with awkward spatial size (L = 49 -> padded + masked).
    logits_b = jax.random.normal(k3, (1, 5, 7, 7), dtype=jnp.float32)
    target_b = jax.random.randint(k4, (1, 7, 7), 0, 5, dtype=jnp.int32)
    lb = jax.block_until_ready(cross_entropy_loss(logits_b, target_b, "mean"))
    assert jnp.allclose(lb, _reference(logits_b, target_b, "mean"), rtol=1e-5, atol=1e-5)

    # 3) NCHW path, multi-tile grid + masking (forced small tiles).
    logits_c = jax.random.normal(k5, (1, 3, 48, 48), dtype=jnp.float32)
    target_c = jax.random.randint(k6, (1, 48, 48), 0, 3, dtype=jnp.int32)
    lc = jax.block_until_ready(cross_entropy_loss(logits_c, target_c, "mean",
                                                  max_tile_rows=8))
    assert jnp.allclose(lc, _reference(logits_c, target_c, "mean"), rtol=1e-5, atol=1e-5)

    # 4) 2-D path (no HBM transpose), multi-tile + row masking.
    M2, C2 = 200, 8
    logits_d = jax.random.normal(k7, (M2, C2), dtype=jnp.float32)
    target_d = jax.random.randint(k8, (M2,), 0, C2, dtype=jnp.int32)
    ld = jax.block_until_ready(cross_entropy_loss(logits_d, target_d, "mean",
                                                  max_tile_rows=64))
    assert jnp.allclose(ld, _reference(logits_d, target_d, "mean"), rtol=1e-5, atol=1e-5)
    ld_full = jax.block_until_ready(cross_entropy_loss(logits_d, target_d, "sum"))
    assert jnp.allclose(ld_full, _reference(logits_d, target_d, "sum"), rtol=1e-4, atol=1e-4)

    print("KERNEL_OK")
</pallas_src>

<mosaic_0001>
module attributes {stable_mosaic.version = 11 : i64} {
  func.func @kernel(%arg0: i32, %arg1: i32, %arg2: memref<1x4x2x128xf32, #tpu.memory_space<vmem>>, %arg3: memref<1x2x128xi32, #tpu.memory_space<vmem>>, %arg4: memref<1x1x1x1xf32, #tpu.memory_space<vmem>>) attributes {dimension_semantics = [#tpu.dimension_semantics<parallel>, #tpu.dimension_semantics<parallel>], iteration_bounds = array<i64: 2, 1>, scalar_prefetch = 0 : i64, scratch_operands = 0 : i64, tpu.core_type = #tpu.core_type<tc>, window_params = [{transform_indices = @transform_0, window_bounds = array<i64: 1, 4, 2, 128>}, {transform_indices = @transform_1, window_bounds = array<i64: 1, 2, 128>}, {transform_indices = @transform_2, window_bounds = array<i64: 1, 1, 1, 1>}]} {
    %c0 = arith.constant 0 : index
    %c0_0 = arith.constant 0 : index
    %c0_1 = arith.constant 0 : index
    %c0_2 = arith.constant 0 : index
    %0 = vector.load %arg2[%c0, %c0_0, %c0_1, %c0_2] : memref<1x4x2x128xf32, #tpu.memory_space<vmem>>, vector<1x4x2x128xf32>
    %1 = vector.shape_cast %0 : vector<1x4x2x128xf32> to vector<4x2x128xf32>
    %c0_3 = arith.constant 0 : index
    %c0_4 = arith.constant 0 : index
    %c0_5 = arith.constant 0 : index
    %2 = vector.load %arg3[%c0_3, %c0_4, %c0_5] : memref<1x2x128xi32, #tpu.memory_space<vmem>>, vector<1x2x128xi32>
    %3 = vector.shape_cast %2 : vector<1x2x128xi32> to vector<2x128xi32>
    %cst = arith.constant dense<0xFF800000> : vector<2x128xf32>
    %4 = vector.multi_reduction <maximumf>, %1, %cst [0] : vector<4x2x128xf32> to vector<2x128xf32>
    %5 = vector.shape_cast %4 : vector<2x128xf32> to vector<1x2x128xf32>
    %6 = vector.broadcast %5 : vector<1x2x128xf32> to vector<4x2x128xf32>
    %7 = arith.subf %1, %6 : vector<4x2x128xf32>
    %8 = math.exp %7 : vector<4x2x128xf32>
    %cst_6 = arith.constant dense<0.000000e+00> : vector<2x128xf32>
    %9 = vector.multi_reduction <add>, %8, %cst_6 [0] : vector<4x2x128xf32> to vector<2x128xf32>
    %10 = math.log %9 : vector<2x128xf32>
    %11 = tpu.iota {dimensions = array<i32: 0>} : vector<4x2x128xi32>
    %12 = vector.shape_cast %3 : vector<2x128xi32> to vector<1x2x128xi32>
    %13 = vector.broadcast %12 : vector<1x2x128xi32> to vector<4x2x128xi32>
    %14 = arith.cmpi eq, %11, %13 : vector<4x2x128xi32>
    %cst_7 = arith.constant 0.000000e+00 : f32
    %15 = vector.broadcast %cst_7 : f32 to vector<4x2x128xf32>
    %16 = arith.select %14, %1, %15 : vector<4x2x128xi1>, vector<4x2x128xf32>
    %cst_8 = arith.constant dense<0.000000e+00> : vector<2x128xf32>
    %17 = vector.multi_reduction <add>, %16, %cst_8 [0] : vector<4x2x128xf32> to vector<2x128xf32>
    %18 = arith.addf %4, %10 : vector<2x128xf32>
    %19 = arith.subf %18, %17 : vector<2x128xf32>
    %20 = vector.shape_cast %19 : vector<2x128xf32> to vector<1x2x128xf32>
    %cst_9 = arith.constant dense<0.000000e+00> : vector<1xf32>
    %21 = vector.multi_reduction <add>, %20, %cst_9 [1, 2] : vector<1x2x128xf32> to vector<1xf32>
    %22 = vector.shape_cast %21 : vector<1xf32> to vector<1x1x1xf32>
    %23 = vector.extract %22[0, 0, 0] : f32 from vector<1x1x1xf32>
    %24 = vector.broadcast %23 : f32 to vector<1x1xf32>
    %25 = vector.shape_cast %24 : vector<1x1xf32> to vector<1x1x1x1xf32>
    %c0_10 = arith.constant 0 : index
    %c0_11 = arith.constant 0 : index
    %c0_12 = arith.constant 0 : index
    %c0_13 = arith.constant 0 : index
    %26 = vector.load %arg4[%c0_10, %c0_11, %c0_12, %c0_13] : memref<1x1x1x1xf32, #tpu.memory_space<vmem>>, vector<1x1x1x1xf32>
    tpu.vector_store %arg4[%c0_10, %c0_11, %c0_12, %c0_13], %25 {strides = array<i32>} : memref<1x1x1x1xf32, #tpu.memory_space<vmem>>, vector<1x1x1x1xf32>,
    return
  }
  func.func @transform_0(%arg0: i32, %arg1: i32) -> (i32, i32, i32, i32) {
    %c0_i32 = arith.constant 0 : i32
    %c0_i32_0 = arith.constant 0 : i32
    %c0_i32_1 = arith.constant 0 : i32
    return %arg0, %c0_i32, %arg1, %c0_i32_0 : i32, i32, i32, i32
  }
  func.func @transform_1(%arg0: i32, %arg1: i32) -> (i32, i32, i32) {
    %c0_i32 = arith.constant 0 : i32
    %c0_i32_0 = arith.constant 0 : i32
    return %arg0, %arg1, %c0_i32 : i32, i32, i32
  }
  func.func @transform_2(%arg0: i32, %arg1: i32) -> (i32, i32, i32, i32) {
    %c0_i32 = arith.constant 0 : i32
    %c0_i32_0 = arith.constant 0 : i32
    %c0_i32_1 = arith.constant 0 : i32
    return %arg0, %arg1, %c0_i32, %c0_i32_0 : i32, i32, i32, i32
  }
}

</mosaic_0001>

<bundles_post_ra>
// kernel: tpu_custom_call.1
= control target key start
LH: loop header
LB: loop body
LE: loop exit
PB: predicated region body
PF: predicated region fallthrough
CT: control target
= control target key end

     0   :  { %7 = vsyncpa [#allocation3], 0  ;;  %s791_s0 = inlined_call_operand.hbm [shape: f32[2,4,2,128], index: 0, kind: input, shape index: {}]   ;;  %s792_s1 = inlined_call_operand.hbm [shape: s32[2,2,128], index: 1, kind: input, shape index: {}]   ;;  %s793_s2 = inlined_call_operand.vmem [shape: f32[2,1,1,1], index: 2, kind: output, shape index: {}]  }
   0x1   :  { %9 = vsyncpa [#allocation3 + $0x1], 0 }
   0x2   :  { %10 = vsyncpa [#allocation5], 0 }
   0x3   :  { %12 = vsyncpa [#allocation5 + $0x1], 0  ;;  %s614_s9 = smov 0   ;;  %s616_s10 = smov 0  }
   0x4   :  { %s618_s11 = smov 0   ;;  %s620_s12 = smov 0  }
   0x5   :  { %s622_s13 = smov 0   ;;  %s624_s14 = smov 0  }
   0x6 LB: > { %s390_s15 = sadd.s32 4294967295, %s593_s14   ;;  %s30_s16 = sadd.s32 1, %s589_s13  ;;  %s593_s14 = sphi %s624_s14, %s18_s14   ;;  %s589_s13 = sphi %s622_s13, %s805_s13   ;;  %s585_s12 = sphi %s620_s12, %s804_s12   ;;  %s581_s11 = sphi %s618_s11, %s803_s11   ;;  %s577_s10 = sphi %s616_s10, %s802_s10   ;;  %s573_s9 = sphi %s614_s9, %s801_s9  }
   0x7   : > { %p32_p0 = scmp.ge.s32.totalorder %s30_s16, 2  ;;  %s39_s17 = sadd.s32 1, %s581_s11 }
   0x8   : > { %p46_p1 = scmp.ne.s32.totalorder %s581_s11, %s577_s10  ;;  %p47_p2 = scmp.eq.s32.totalorder %s593_s14, 0 }
   0x9   : > { %s807_s16 = smov (%p32_p0, %s30_s16), 0  ;;  %p52_p4 = scmp.ne.s32.totalorder %s577_s10, %s573_s9 }
   0xa   : > { %p650_p3 = por %p47_p2, %p46_p1  ;;  %s34_s19 = ssub.s32 %s589_s13, %s807_s16 }
   0xb   : > { %p53_p5 = scmp.eq.s32.totalorder %s390_s15, 0  ;;  %p37_p6 = scmp.eq.s32.totalorder %s34_s19, 0 }
   0xc   : > { %p418_p8 = scmp.lt.s32.totalorder %s593_s14, 2  ;;  %s666_s22 = sand.u32 1, %s581_s11  }
   0xd   : > { %p657_p7 = por %p53_p5, %p52_p4  ;;  %s404_s23 = sshll.u32 %s589_s13, 7 }
   0xe   : > { %s663_s21 = scalar_select %p37_p6, %s581_s11, %s39_s17  }
   0xf   : > { %s796_s20 = scalar_select %p657_p7, 1, 0 }
  0x10   : > { %s394_s24 = sshll.u32 %s666_s22, 3  ;;  %s673_s27 = scalar_lea.hbm %s791_s0, %s404_s23 }
  0x11   : > { %s136_s28 = scalar_lea.vmem [#allocation2], %s394_s24  ;;  %p677_p9 = pnand %p418_p8, %p650_p3 }
  0x12   : > { %s144_s29 = sshll.u32 %s136_s28, 4  ;;  %s133_s3 = scalar_lea.sflag [#allocation3], %s666_s22  ;;  %s681_s29 = int_to_ptr.vmem [resolvable:$true] %s144_s29 }
  0x13   : > { %s479_s4 = scalar_lea.hbm %s673_s27, 128  ;;  %p481_p11 = pneg %p677_p9 }
  0x14   : > { %p480_p10 = scmp.ne.s32.totalorder %s673_s27, %s479_s4  ;;  %s484_s7 = scalar_lea.hbm %s791_s0, 256 }
  0x15   : > { %p485_p0 = scmp.lt.u32.totalorder %s673_s27, %s791_s0  ;;  %p486_p1 = scmp.lt.u32.totalorder %s484_s7, %s479_s4 }
  0x16   : > { %p482_p12 = pnand %p481_p11, %p480_p10  ;;  %p488_p3 = scmp.lt.u32.totalorder %s479_s4, %s673_s27 }
  0x17   : > { %p487_p2 = por %p486_p1, %p485_p0 }
  0x18   : > { %p483_p13 = pneg %p482_p12 }
  0x19   : > { %p489_p4 = por %p488_p3, %p487_p2 }
  0x1b   : > { %p490_p5 = pnand %p489_p4, %p483_p13 }
  0x1d   : > { %493 = shalt.err (!%p490_p5)
}
  0x1e   : > { %s494_s15 = scalar_lea.vmem %s681_s29, 128  ;;  %s595_s17 = smov [#allocation2]  }
  0x1f   : > { %p495_p6 = scmp.ne.s32.totalorder %s681_s29, %s494_s15  ;;  %s499_s18 = sshll.u32 %s595_s17, 4  ;;  %s500_s18 = int_to_ptr.vmem [resolvable:$false] %s499_s18 }
  0x20   : > { %s501_s19 = scalar_lea.vmem %s500_s18, 256  ;;  %p502_p12 = scmp.lt.s32.totalorder %s681_s29, %s500_s18 }
  0x21   : > { %p497_p8 = pnand %p495_p6, %p481_p11  ;;  %p503_p0 = scmp.lt.s32.totalorder %s501_s19, %s494_s15 }
  0x23   : > { %p498_p10 = pneg %p497_p8  ;;  %p504_p1 = por %p503_p0, %p502_p12 }
  0x25   : > { %p505_p2 = pnand %p504_p1, %p498_p10 }
  0x27   : > { %508 = shalt.err (!%p505_p2)
}
  0x28   : > { %s596_s23 = smov 32   ;;  %s597_s24 = smov 2  }
  0x29   : > { %414 = dma.hbm_to_vmem [thread:$0]  (!%p677_p9), %s673_s27, 128, %s681_s29, %s133_s3, %s596_s23, %s596_s23, %s597_s24  }
  0x2a   : > { %p399_p13 = scmp.ge.s32.totalorder %s593_s14, 1  ;;  %p171_p3 = scmp.lt.s32.totalorder %s593_s14, 3 }
  0x2b   : > { %s397_s25 = sshll.u32 %s666_s22, 1  ;;  %s398_s28 = sshll.u32 %s589_s13, 5 }
  0x2c   : > { %p714_p4 = pnand %p399_p13, %p171_p3  ;;  %s158_s4 = scalar_lea.vmem [#allocation4], %s397_s25 }
  0x2d   : > { %s166_s5 = sshll.u32 %s158_s4, 4  ;;  %s722_s8 = scalar_lea.hbm %s792_s1, %s398_s28  ;;  %s167_s5 = int_to_ptr.vmem [resolvable:$true] %s166_s5 }
  0x2e   : > { %s798_s26 = scalar_select %p714_p4, 1, 0 }
  0x2f   : > { %s155_s27 = scalar_lea.sflag [#allocation5], %s666_s22  ;;  %s509_s29 = scalar_lea.hbm %s722_s8, 32 }
  0x30   : > { %p510_p5 = scmp.ne.s32.totalorder %s722_s8, %s509_s29  ;;  %s514_s15 = scalar_lea.hbm %s792_s1, 64 }
  0x31   : > { %p515_p10 = scmp.lt.u32.totalorder %s722_s8, %s792_s1  ;;  %p516_p12 = scmp.lt.u32.totalorder %s514_s15, %s509_s29 }
  0x32   : > { %p512_p6 = pnand %p510_p5, %p481_p11  ;;  %p518_p1 = scmp.lt.u32.totalorder %s509_s29, %s722_s8 }
  0x33   : > { %p517_p0 = por %p516_p12, %p515_p10 }
  0x34   : > { %p513_p8 = pneg %p512_p6 }
  0x35   : > { %p519_p2 = por %p518_p1, %p517_p0 }
  0x37   : > { %p520_p13 = pnand %p519_p2, %p513_p8 }
  0x39   : > { %523 = shalt.err (!%p520_p13)
}
  0x3a   : > { %s524_s22 = scalar_lea.vmem %s167_s5, 32  ;;  %s598_s19 = smov [#allocation4]  }
  0x3b   : > { %p525_p3 = scmp.ne.s32.totalorder %s167_s5, %s524_s22  ;;  %s529_s23 = sshll.u32 %s598_s19, 4  ;;  %s530_s23 = int_to_ptr.vmem [resolvable:$false] %s529_s23 }
  0x3c   : > { %s531_s24 = scalar_lea.vmem %s530_s23, 64  ;;  %p532_p7 = scmp.lt.s32.totalorder %s167_s5, %s530_s23 }
  0x3d   : > { %p527_p5 = pnand %p525_p3, %p481_p11  ;;  %p533_p4 = scmp.lt.s32.totalorder %s531_s24, %s524_s22 }
  0x3f   : > { %p528_p6 = pneg %p527_p5  ;;  %p534_p10 = por %p533_p4, %p532_p7 }
  0x41   : > { %p535_p12 = pnand %p534_p10, %p528_p6 }
  0x43   : > { %538 = shalt.err (!%p535_p12)
}
  0x44   : > { %417 = dma.hbm_to_vmem [thread:$0]  (!%p677_p9), %s722_s8, 32, %s167_s5, %s155_s27  }
  0x45   : > { %p799_p8 = scmp.ne.s32.totalorder %s798_s26, 0 }
  0x46   : > { %s177_s25 = sand.u32 (!%p799_p8), 1, %s577_s10   ;;  %p800_p11 = scmp.ne.s32.totalorder (!%p799_p8), %s796_s20, 0 }
  0x47   : > { %175 = sbr.rel (%p799_p8) target bundleno = 336 (0x150), region = 28  ;;  %s400_s28 = sshll.u32 (!%p799_p8), %s177_s25, 3 }
  0x48   : > { %s178_s4 = scalar_lea.sflag (!%p799_p8), [#allocation3], %s177_s25  ;;  %s181_s6 = scalar_lea.vmem (!%p799_p8), [#allocation2], %s400_s28 }
  0x4e   : > { %564 = dma.done.wait (%p800_p11), %s178_s4, 128  }
  0x4f   : > { %566 = vsyncadd (%p800_p11), %s178_s4, 4294967168  ;;  %s401_s7 = sshll.u32 %s177_s25, 1  ;;  %s187_s29 = scalar_lea.sflag [#allocation5], %s177_s25 }
  0x50   : > { %s190_s30 = scalar_lea.vmem [#allocation4], %s401_s7 }
  0x51   : > { %568 = dma.done.wait (%p800_p11), %s187_s29, 32  }
  0x52   : > { %570 = vsyncadd (%p800_p11), %s187_s29, 4294967264  ;;  %vm228_vm0 = vcmask 1041408   ;;  %v223_v0 = vld [vmem:[%s181_s6] sm:$0x3]  ;;  %v224_v1 = vld [vmem:[%s181_s6 + $0x2] sm:$0x3] }
  0x53   : > { %v225_v2 = vld [vmem:[%s181_s6 + $0x4] sm:$0x3]  ;;  %v226_v3 = vld [vmem:[%s181_s6 + $0x6] sm:$0x3]  ;;  %v229_v4 = vsel %vm228_vm0, %v223_v0, -inf  ;;  %v230_v5 = vsel %vm228_vm0, %v224_v1, -inf }
  0x54   : > { %v231_v6 = vsel %vm228_vm0, %v225_v2, -inf  ;;  %v232_v7 = vsel %vm228_vm0, %v226_v3, -inf  ;;  %v233_v8 = vmax.f32 %v229_v4, %v230_v5  ;;  %v227_v20 = vld [vmem:[%s190_s30] sm:$0x3]  ;;  %p217_p7 = scmp.lt.s32.totalorder %s585_s12, 1  ;;  %vm285_vm5 = vcmask 0  }
  0x55   : > { %v234_v9 = vmax.f32 %v231_v6, %v232_v7  ;;  %vm257_vm1 = vcmp.eq.s32.totalorder %v227_v20, 0  ;;  %vm258_vm2 = vcmp.eq.s32.totalorder %v227_v20, 1  ;;  %vm259_vm3 = vcmp.eq.s32.totalorder %v227_v20, 2 }
  0x56   : > { %v261_v30 = vsel %vm257_vm1, %v223_v0, 0.0  ;;  %v262_v31 = vsel %vm258_vm2, %v224_v1, 0.0  ;;  %v263_v35 = vsel %vm259_vm3, %v225_v2, 0.0  ;;  %vm260_vm4 = vcmp.eq.s32.totalorder %v227_v20, 3  ;;  %s809_s12 = smov (!%p217_p7, %s585_s12), 1 }
  0x57   : > { %v235_v10 = vmax.f32 %v233_v8, %v234_v9  ;;  %v265_v33 = vsel %vm228_vm0, %v261_v30, 0.0  ;;  %v266_v34 = vsel %vm228_vm0, %v262_v31, 0.0  ;;  %v268_v37 = vsel %vm228_vm0, %v263_v35, 0.0  ;;  %s222_s5 = scalar_lea.vmem %s793_s2, %s809_s12 }
  0x58   : > { %v267_v36 = vadd.f32 %v266_v34, %v265_v33  ;;  %v264_v38 = vsel %vm260_vm4, %v226_v3, 0.0 }
  0x59   : > { %v236_v11 = vsub.f32 %v223_v0, %v235_v10  ;;  %v237_v12 = vsub.f32 %v224_v1, %v235_v10  ;;  %v238_v13 = vsub.f32 %v225_v2, %v235_v10  ;;  %v239_v14 = vsub.f32 %v226_v3, %v235_v10 }
  0x5a   : > { %v269_v39 = vadd.f32 %v268_v37, %v267_v36  ;;  %v270_v40 = vsel %vm228_vm0, %v264_v38, 0.0 }
  0x5b   : > { %v240_v15 = vmul.f32 1.442695, %v236_v11  ;;  %v242_v16 = vmul.f32 1.442695, %v237_v12  ;;  %v244_v17 = vmul.f32 1.442695, %v238_v13 }
  0x5c   : > { %v246_v18 = vmul.f32 1.442695, %v239_v14  ;;  %v271_v43 = vadd.f32 %v270_v40, %v269_v39 }
  0x5d   : > { %469 = vpow2.f32 %v240_v15 }
  0x5e   : > { %471 = vpow2.f32 %v242_v16 }
  0x5f   : > { %473 = vpow2.f32 %v244_v17 }
  0x60   : > { %475 = vpow2.f32 %v246_v18 }
  0x67   : > { %v470_v19 = vpop.eup %469 }
  0x68   : > { %v472_v21 = vpop.eup %471  ;;  %v248_v22 = vsel %vm228_vm0, %v470_v19, 0.0 }
  0x69   : > { %v474_v23 = vpop.eup %473  ;;  %v249_v24 = vsel %vm228_vm0, %v472_v21, 0.0 }
  0x6a   : > { %v476_v25 = vpop.eup %475  ;;  %v250_v26 = vadd.f32 %v249_v24, %v248_v22  ;;  %v251_v27 = vsel %vm228_vm0, %v474_v23, 0.0 }
  0x6b   : > { %v253_v28 = vsel %vm228_vm0, %v476_v25, 0.0 }
  0x6c   : > { %v252_v29 = vadd.f32 %v251_v27, %v250_v26 }
  0x6e   : > { %v254_v32 = vadd.f32 %v253_v28, %v252_v29 }
  0x70   : > { %477 = vlog2.f32 %v254_v32 }
  0x7a   : > { %v478_v41 = vpop.eup %477 }
  0x7b   : > { %v256_v42 = vmul.f32 0.6931472, %v478_v41 }
  0x7d   : > { %v272_v44 = vadd.f32 %v256_v42, %v235_v10 }
  0x7f   : > { %v273_v45 = vsub.f32 %v272_v44, %v271_v43 }
  0x81   : > { %v274_v46 = vsel %vm228_vm0, %v273_v45, 0.0 }
  0x82   : > { %275 = vadd.xlane.f32.xlu0 %v274_v46 }
 0x10f   : > { %v276_v47 = vpop.xlane.xlu0 %275 }
 0x110   : > { %v277_v48 = vrot.slane %v276_v47, 4 }
 0x112   : > { %v278_v49 = vadd.f32 %v277_v48, %v276_v47 }
 0x114   : > { %v279_v50 = vrot.slane %v278_v49, 2 }
 0x116   : > { %v280_v51 = vadd.f32 %v279_v50, %v278_v49 }
 0x118   : > { %v281_v52 = vrot.slane %v280_v51, 1 }
 0x11a   : > { %v282_v53 = vadd.f32 %v281_v52, %v280_v51 }
 0x11c   : > { %405 = vpush %v282_v53 }
 0x14d   : > { %s406_s8 = spop %405 }
 0x14e   : > { %v284_v54 = vstv %s406_s8 }
 0x14f   : > { %286 = vst.msk [vmem:[%s222_s5] sm:$0x1] %vm285_vm5, %v284_v54 }
 0x150 PF: > { %s18_s14 = sadd.s32 1, %s593_s14   ;;  %s801_s9 = smov %s577_s10 }
 0x151   : > { %p15_p9 = scmp.ge.s32.totalorder %s18_s14, 4   ;;  %s802_s10 = smov %s581_s11 }
 0x152   : > { %s803_s11 = smov %s663_s21  ;;  %s804_s12 = smov %s589_s13 }
 0x153   : > { %s805_s13 = smov %s807_s16  ;;  %17 = sbr.rel (!%p15_p9) target bundleno = 6 (0x6), region = 81 }
 0x15a   :  { %310 = vsyncpa [#allocation3], 1 }
 0x15b   :  { %312 = vsyncpa [#allocation3 + $0x1], 1 }
 0x15c   :  { %313 = vsyncpa [#allocation5], 1 }
 0x15d   :  { %315 = vsyncpa [#allocation5 + $0x1], 1 }

</bundles_post_ra>
